<compile_context>
chip_gen: v6e
topology: v6e:2x2x1
jax: 0.10.0
libtpu: 0.0.40
codegen_flags: <defaults>
</compile_context>

<pallas_src>
import functools

import jax
import jax.numpy as jnp
from jax.experimental import pallas as pl
from jax.experimental.pallas import tpu as pltpu

_LANES = 1024          # wide lane dim -> unmasked, lane-dense vst streams
_MAX_TILE_ROWS = 512   # 512 x 1024 f32 = 2 MiB per block


def _make_scale_kernel(neg_alpha):
    """Kernel that scales its tile by the closed-over constant -alpha."""
    def kernel(g_ref, o_ref):
        o_ref[...] = g_ref[...] * neg_alpha
    return kernel


def _scale_by_neg_alpha(g, alpha):
    """Elementwise -alpha * g in g's native dtype, via a Pallas kernel."""
    shape, dtype = g.shape, g.dtype

    flat = g.reshape(-1)
    n = flat.shape[0]
    padded = ((n + _LANES - 1) // _LANES) * _LANES
    if padded != n:
        flat = jnp.pad(flat, (0, padded - n))
    slab = flat.reshape(-1, _LANES)       # metadata-only view when already aligned
    rows = slab.shape[0]

    if rows <= _MAX_TILE_ROWS:
        tile_rows = rows                  # full-extent block: always legal
    else:
        tile_rows = _MAX_TILE_ROWS        # multiple of 8/16: legal sub-block

    grid = (pl.cdiv(rows, tile_rows),)

    out = pl.pallas_call(
        _make_scale_kernel(-float(alpha)),
        out_shape=jax.ShapeDtypeStruct(slab.shape, dtype),
        grid_spec=pl.GridSpec(
            grid=grid,
            in_specs=[pl.BlockSpec((tile_rows, _LANES), lambda i: (i, 0))],
            out_specs=pl.BlockSpec((tile_rows, _LANES), lambda i: (i, 0)),
        ),
        compiler_params=pltpu.CompilerParams(
            dimension_semantics=("parallel",),
        ),
    )(slab)

    out_flat = out.reshape(-1)
    if padded != n:
        out_flat = out_flat[:n]
    return out_flat.reshape(shape)


@functools.partial(jax.custom_vjp, nondiff_argnums=(1,))
def gradient_reversal(x, alpha):
    # Forward is the identity: return x directly (no kernel, no HBM traffic).
    return x


def _grad_rev_fwd(x, alpha):
    # No residuals needed: cotangent already carries shape/dtype.
    return x, None


def _grad_rev_bwd(alpha, _res, g):
    return (_scale_by_neg_alpha(g, alpha),)


gradient_reversal.defvjp(_grad_rev_fwd, _grad_rev_bwd)


class GradientReversal:
    """JAX/Pallas equivalent of the PyTorch GradientReversal module."""

    def __init__(self, alpha):
        self.alpha = float(alpha)

    def __call__(self, x):
        return gradient_reversal(x, self.alpha)


if __name__ == "__main__":
    key = jax.random.PRNGKey(0)
    # layout: NCHW, e.g. batch=2, channels=4, spatial=16x16
    x = jax.random.normal(key, (2, 4, 16, 16), dtype=jnp.float32)

    module = GradientReversal(alpha=0.5)

    # Forward: identity
    y = jax.block_until_ready(module(x))
    assert y.shape == x.shape and y.dtype == x.dtype
    assert bool(jnp.allclose(y, x)), "forward must be identity"

    # Backward: gradient is -alpha * upstream gradient (Pallas kernel path)
    loss_fn = lambda a: jnp.sum(module(a) * 2.0)
    g = jax.block_until_ready(jax.grad(loss_fn)(x))
    assert g.shape == x.shape and g.dtype == x.dtype
    assert bool(jnp.allclose(g, -0.5 * 2.0 * jnp.ones_like(x))), "reversed grad mismatch"

    print("KERNEL_OK")
</pallas_src>

<mosaic_0001>
module attributes {stable_mosaic.version = 11 : i64} {
  func.func @kernel(%arg0: i32, %arg1: memref<2x1024xf32, #tpu.memory_space<vmem>>, %arg2: memref<2x1024xf32, #tpu.memory_space<vmem>>) attributes {dimension_semantics = [#tpu.dimension_semantics<parallel>], iteration_bounds = array<i64: 1>, scalar_prefetch = 0 : i64, scratch_operands = 0 : i64, tpu.core_type = #tpu.core_type<tc>, window_params = [{transform_indices = @transform_0, window_bounds = array<i64: 2, 1024>}, {transform_indices = @transform_1, window_bounds = array<i64: 2, 1024>}]} {
    %c0 = arith.constant 0 : index
    %c0_0 = arith.constant 0 : index
    %0 = vector.load %arg1[%c0, %c0_0] : memref<2x1024xf32, #tpu.memory_space<vmem>>, vector<2x1024xf32>
    %cst = arith.constant -5.000000e-01 : f32
    %1 = vector.broadcast %cst : f32 to vector<2x1024xf32>
    %2 = arith.mulf %0, %1 : vector<2x1024xf32>
    %c0_1 = arith.constant 0 : index
    %c0_2 = arith.constant 0 : index
    %3 = vector.load %arg2[%c0_1, %c0_2] : memref<2x1024xf32, #tpu.memory_space<vmem>>, vector<2x1024xf32>
    tpu.vector_store %arg2[%c0_1, %c0_2], %2 {strides = array<i32>} : memref<2x1024xf32, #tpu.memory_space<vmem>>, vector<2x1024xf32>,
    return
  }
  func.func @transform_0(%arg0: i32) -> (i32, i32) {
    %c0_i32 = arith.constant 0 : i32
    %c0_i32_0 = arith.constant 0 : i32
    return %arg0, %c0_i32 : i32, i32
  }
  func.func @transform_1(%arg0: i32) -> (i32, i32) {
    %c0_i32 = arith.constant 0 : i32
    %c0_i32_0 = arith.constant 0 : i32
    return %arg0, %c0_i32 : i32, i32
  }
}

</mosaic_0001>

<bundles_post_ra>
// kernel: tpu_custom_call.1
= control target key start
LH: loop header
LB: loop body
LE: loop exit
PB: predicated region body
PF: predicated region fallthrough
CT: control target
= control target key end

     0   :  { %6 = vsyncpa [#allocation3], 0  ;;  %s106_s0 = inlined_call_operand.hbm [shape: f32[2,1024], index: 0, kind: input, shape index: {}]   ;;  %s107_s1 = inlined_call_operand.hbm [shape: f32[2,1024], index: 1, kind: output, shape index: {}]  }
   0x1   :  { %7 = vsyncpa [#allocation4], 0  ;;  %s88_s6 = smov [#allocation2]  }
   0x2   :  { %s14_s7 = sshll.u32 %s88_s6, 4  ;;  %s15_s7 = int_to_ptr.vmem [resolvable:$true] %s14_s7 }
   0x3   :  { %s52_s8 = scalar_lea.vmem %s15_s7, 256  ;;  %p57_p1 = scmp.lt.s32.totalorder %s15_s7, %s15_s7 }
   0x4   :  { %p53_p0 = scmp.ne.s32.totalorder %s15_s7, %s52_s8  ;;  %p58_p2 = scmp.lt.s32.totalorder %s52_s8, %s52_s8 }
   0x6   :  { %p59_p3 = por %p58_p2, %p57_p1 }
   0x8   :  { %p60_p4 = pnand %p59_p3, %p53_p0 }
   0xa   :  { %63 = shalt.err (!%p60_p4)
}
   0xb   :  { %17 = dma.hbm_to_vmem [thread:$0]  %s106_s0, 256, %s15_s7, [#allocation3]  }
   0xc   :  { %84 = dma.done.wait [#allocation3], 256  }
   0xd   :  { %85 = vsyncadd [#allocation3], 4294967040  ;;  %s89_s11 = smov [#allocation5]   ;;  %v21_v0 = vld [vmem:[#allocation2] sm:$0xff]  ;;  %v22_v1 = vld [vmem:[#allocation2 + $0x8] sm:$0xff] }
   0xe   :  { %s33_s12 = sshll.u32 %s89_s11, 4  ;;  %v23_v2 = vmul.f32 -0.5, %v21_v0  ;;  %v24_v3 = vmul.f32 -0.5, %v22_v1  ;;  %s34_s12 = int_to_ptr.vmem [resolvable:$true] %s33_s12 }
   0xf   :  { %s64_s13 = scalar_lea.vmem %s34_s12, 256  ;;  %p69_p6 = scmp.lt.s32.totalorder %s34_s12, %s34_s12 }
  0x10   :  { %25 = vst [vmem:[#allocation5] sm:$0xff] %v23_v2  ;;  %26 = vst [vmem:[#allocation5 + $0x8] sm:$0xff] %v24_v3  ;;  %p65_p5 = scmp.ne.s32.totalorder %s34_s12, %s64_s13  ;;  %p70_p7 = scmp.lt.s32.totalorder %s64_s13, %s64_s13 }
  0x12   :  { %p71_p8 = por %p70_p7, %p69_p6 }
  0x14   :  { %p72_p9 = pnand %p71_p8, %p65_p5 }
  0x16   :  { %75 = shalt.err (!%p72_p9)
}
  0x17   :  { %36 = dma.vmem_to_hbm [thread:$0]  %s34_s12, 256, %s107_s1, [#allocation4]  }
  0x18   :  { %86 = dma.done.wait [#allocation4], 256  }
  0x19   :  { %87 = vsyncadd [#allocation4], 4294967040 }
  0x1a   :  { %40 = vsyncpa [#allocation3], 1 }
  0x1b   :  { %41 = vsyncpa [#allocation4], 1 }

</bundles_post_ra>
